<compile_context>
chip_gen: v7x
topology: tpu7x:2x2x1
jax: 0.10.0
libtpu: 0.0.40
codegen_flags: <defaults>
</compile_context>

<pallas_src>
import jax
import jax.numpy as jnp
from jax.experimental import pallas as pl
from jax.experimental.pallas import tpu as pltpu

NUM_CLASSES = 805  # matches OneHot(num_classes=805)


def one_hot_kernel(x_ref, o_ref):
    # x_ref: (tile, 1) int32 class indices
    # o_ref: (tile, num_classes) one-hot rows
    idx = x_ref[...]  # (tile, 1)
    # Single row of class ids; broadcasting in the compare handles the rows.
    classes = jax.lax.broadcasted_iota(jnp.int32, (1, o_ref.shape[1]), 1)
    o_ref[...] = (idx == classes).astype(o_ref.dtype)


def one_hot_pallas(x, num_classes=NUM_CLASSES, tile=2048,
                   out_dtype=jnp.int32, vmem_limit_bytes=32 << 20):
    """Pallas equivalent of torch.nn.functional.one_hot(x, num_classes).

    tile: rows of one-hot output produced per grid step.  Default 2048.
      VMEM budget per step (double-buffered), int32 output:
        output: 2 * tile * 896 * 4 B   (805 classes lane-padded to 896)
        input : 2 * tile * 128 * 4 B   ((tile, 1) block lane-padded to 128)
      => ~16.7 MB at tile=2048, which exceeds v5e's 16 MiB scoped default,
      hence vmem_limit_bytes is set explicitly (physical VMEM is 128 MiB on
      v5e/v6e, 64 MiB per TC on v7x, so 32 MiB is safe everywhere).
    out_dtype: output element type.  int32 matches torch's values (torch
      returns int64); the kernel is HBM-write-bound, so int8/bfloat16 are
      ~4x / ~2x faster if the consumer accepts them.
    """
    orig_shape = x.shape
    flat = x.reshape(-1).astype(jnp.int32)
    n = flat.shape[0]

    # Clamp the tile to the (sublane-aligned) row count; keep it a multiple
    # of 8 so the BlockSpec satisfies the (8, 128) tiling constraint.
    tile = int(min(tile, max(8, ((n + 7) // 8) * 8)))

    x2 = flat.reshape(n, 1)
    grid = (pl.cdiv(n, tile),)

    out_bytes = n * num_classes * jnp.dtype(out_dtype).itemsize
    cost = pl.CostEstimate(
        flops=n * num_classes,      # one compare per output element
        transcendentals=0,
        bytes_accessed=out_bytes + n * 4,
    )

    out = pl.pallas_call(
        one_hot_kernel,
        out_shape=jax.ShapeDtypeStruct((n, num_classes), out_dtype),
        grid=grid,
        # Input last dim (1) equals the full array dim, so it is exempt from
        # the 128-lane divisibility requirement; tile is a multiple of 8.
        in_specs=[pl.BlockSpec((tile, 1), lambda i: (i, 0))],
        # num_classes (805) is not a multiple of 128, but the block covers
        # the full class axis (allowed when block dim == full array dim).
        out_specs=pl.BlockSpec((tile, num_classes), lambda i: (i, 0)),
        compiler_params=pltpu.CompilerParams(
            dimension_semantics=("parallel",),
            vmem_limit_bytes=int(vmem_limit_bytes),
        ),
        cost_estimate=cost,
    )(x2)

    return out.reshape(*orig_shape, num_classes)


if __name__ == "__main__":
    key = jax.random.PRNGKey(0)
    # Small integer index tensor, values in [0, NUM_CLASSES).
    x = jax.random.randint(key, (2, 4, 8), 0, NUM_CLASSES, dtype=jnp.int32)

    y = one_hot_pallas(x)
    y = jax.block_until_ready(y)

    # Reference check against jax.nn.one_hot.
    ref = jax.nn.one_hot(x, NUM_CLASSES, dtype=jnp.int32)
    assert y.shape == (2, 4, 8, NUM_CLASSES), y.shape
    assert y.dtype == jnp.int32
    assert bool(jnp.all(y == ref)), "mismatch vs reference one_hot"

    # Also exercise a row count that is not a multiple of the tile / 8 to
    # cover the ragged-tail path (no padding, no post-call slice).
    x2 = jax.random.randint(jax.random.PRNGKey(1), (3, 7), 0, NUM_CLASSES,
                            dtype=jnp.int32)
    y2 = jax.block_until_ready(one_hot_pallas(x2))
    ref2 = jax.nn.one_hot(x2, NUM_CLASSES, dtype=jnp.int32)
    assert y2.shape == (3, 7, NUM_CLASSES), y2.shape
    assert bool(jnp.all(y2 == ref2)), "mismatch vs reference one_hot (ragged)"

    # Exercise the larger-than-one-tile path (multiple grid steps) and the
    # out_dtype knob at a modest size.
    x3 = jax.random.randint(jax.random.PRNGKey(2), (5000,), 0, NUM_CLASSES,
                            dtype=jnp.int32)
    y3 = jax.block_until_ready(one_hot_pallas(x3, tile=2048,
                                              out_dtype=jnp.int8))
    ref3 = jax.nn.one_hot(x3, NUM_CLASSES, dtype=jnp.int8)
    assert y3.shape == (5000, NUM_CLASSES), y3.shape
    assert bool(jnp.all(y3 == ref3)), "mismatch vs reference one_hot (multi-tile)"

    print("KERNEL_OK")
</pallas_src>

<mosaic_0001>
module attributes {stable_mosaic.version = 11 : i64} {
  func.func @one_hot_kernel(%arg0: i32, %arg1: memref<64x1xi32, #tpu.memory_space<vmem>>, %arg2: memref<64x805xi32, #tpu.memory_space<vmem>>) attributes {dimension_semantics = [#tpu.dimension_semantics<parallel>], iteration_bounds = array<i64: 1>, scalar_prefetch = 0 : i64, scratch_operands = 0 : i64, tpu.core_type = #tpu.core_type<tc>, window_params = [{transform_indices = @transform_0, window_bounds = array<i64: 64, 1>}, {transform_indices = @transform_1, window_bounds = array<i64: 64, 805>}]} {
    %c0 = arith.constant 0 : index
    %c0_0 = arith.constant 0 : index
    %0 = vector.load %arg1[%c0, %c0_0] : memref<64x1xi32, #tpu.memory_space<vmem>>, vector<64x1xi32>
    %1 = tpu.iota {dimensions = array<i32: 1>} : vector<1x805xi32>
    %2 = vector.broadcast %0 : vector<64x1xi32> to vector<64x805xi32>
    %3 = vector.broadcast %1 : vector<1x805xi32> to vector<64x805xi32>
    %4 = arith.cmpi eq, %2, %3 : vector<64x805xi32>
    %5 = arith.extui %4 : vector<64x805xi1> to vector<64x805xi32>
    %c0_1 = arith.constant 0 : index
    %c0_2 = arith.constant 0 : index
    %6 = vector.load %arg2[%c0_1, %c0_2] : memref<64x805xi32, #tpu.memory_space<vmem>>, vector<64x805xi32>
    tpu.vector_store %arg2[%c0_1, %c0_2], %5 {strides = array<i32>} : memref<64x805xi32, #tpu.memory_space<vmem>>, vector<64x805xi32>,
    return
  }
  func.func @transform_0(%arg0: i32) -> (i32, i32) {
    %c0_i32 = arith.constant 0 : i32
    %c0_i32_0 = arith.constant 0 : i32
    return %arg0, %c0_i32 : i32, i32
  }
  func.func @transform_1(%arg0: i32) -> (i32, i32) {
    %c0_i32 = arith.constant 0 : i32
    %c0_i32_0 = arith.constant 0 : i32
    return %arg0, %c0_i32 : i32, i32
  }
}

</mosaic_0001>

<bundles_post_ra>
// kernel: tpu_custom_call.1
= control target key start
LH: loop header
LB: loop body
LE: loop exit
PB: predicated region body
PF: predicated region fallthrough
CT: control target
= control target key end

     0   :  { %v264_v2 = vmov 0   ;;  %s463_s0 = inlined_call_operand.vmem [shape: s32[64,1], index: 0, kind: input, shape index: {}]   ;;  %s464_s1 = inlined_call_operand.hbm [shape: s32[64,805], index: 1, kind: output, shape index: {}]  }
   0x1   :  { %v11_v0 = vld [vmem:[%s463_s0 + $0x10] sm:$0xff]  ;;  %v9_v1 = vld [vmem:[%s463_s0] sm:$0xff]  ;;  %239 = vset.pattern.permute.xlu1 %v264_v2  ;;  %238 = vset.pattern.permute.xlu0 %v264_v2 }
   0x2   :  { %32 = vperm.xlu1 %239, %v11_v0   ;;  %26 = vperm.xlu0 %238, %v9_v1  }
   0x3   :  { %6 = vsyncpa [#allocation3], 0  ;;  %v12_v3 = vld [vmem:[%s463_s0 + $0x18] sm:$0xff]  ;;  %v10_v4 = vld [vmem:[%s463_s0 + $0x8] sm:$0xff]  ;;  %v17_v9 = vlaneseq  ;;  %vm167_vm0 = vcmask 302080  }
   0x4   :  { %v14_v5 = vld [vmem:[%s463_s0 + $0x28] sm:$0xff]  ;;  %v13_v6 = vld [vmem:[%s463_s0 + $0x20] sm:$0xff]  ;;  %v16_v7 = vld [vmem:[%s463_s0 + $0x38] sm:$0xff] }
   0x5   :  { %v15_v8 = vld [vmem:[%s463_s0 + $0x30] sm:$0xff]  ;;  %v304_v10 = vand.u32 127, %v17_v9  ;;  %s265_s0 = smov [#allocation2]  }
   0x6   :  { %35 = vperm.xlu1 %239, %v12_v3   ;;  %29 = vperm.xlu0 %238, %v10_v4   ;;  %s223_s22 = sshll.u32 %s265_s0, 4  ;;  %s435_s22 = int_to_ptr.vmem [resolvable:$true] %s223_s22 }
   0x7   :  { %v307_v11 = vadd.s32 128, %v304_v10  ;;  %v310_v12 = vadd.s32 256, %v304_v10  ;;  %v313_v13 = vadd.s32 384, %v304_v10  ;;  %v316_v14 = vadd.s32 512, %v304_v10  ;;  %s240_s23 = scalar_lea.vmem %s435_s22, 7168  ;;  %p245_p1 = scmp.lt.s32.totalorder %s435_s22, %s435_s22 }
   0x8   :  { %v319_v15 = vadd.s32 640, %v304_v10  ;;  %v322_v16 = vadd.s32 768, %v304_v10  ;;  %p241_p0 = scmp.ne.s32.totalorder %s435_s22, %s240_s23  ;;  %p246_p2 = scmp.lt.s32.totalorder %s240_s23, %s240_s23 }
   0xa   :  { %41 = vperm.xlu1 %239, %v14_v5   ;;  %38 = vperm.xlu0 %238, %v13_v6   ;;  %p247_p3 = por %p246_p2, %p245_p1 }
   0xc   :  { %p248_p4 = pnand %p247_p3, %p241_p0 }
   0xe   :  { %47 = vperm.xlu1 %239, %v16_v7   ;;  %44 = vperm.xlu0 %238, %v15_v8  }
  0x81   :  { %v33_v17 = vpop.permute.xlu1 %32  ;;  %v27_v18 = vpop.permute.xlu0 %26 }
  0x82   :  { %vm63_vm1 = vcmp.eq.s32.totalorder %v33_v17, %v304_v10  ;;  %vm64_vm2 = vcmp.eq.s32.totalorder %v33_v17, %v307_v11  ;;  %vm65_vm3 = vcmp.eq.s32.totalorder %v33_v17, %v310_v12  ;;  %vm66_vm4 = vcmp.eq.s32.totalorder %v33_v17, %v313_v13 }
  0x83   :  { %vm67_vm5 = vcmp.eq.s32.totalorder %v33_v17, %v316_v14  ;;  %vm68_vm6 = vcmp.eq.s32.totalorder %v33_v17, %v319_v15  ;;  %vm69_vm7 = vcmp.eq.s32.totalorder %v33_v17, %v322_v16  ;;  %v119_v19 = vsel %vm63_vm1, 1, %v264_v2 }
  0x84   :  { %v120_v20 = vsel %vm64_vm2, 1, %v264_v2  ;;  %v121_v21 = vsel %vm65_vm3, 1, %v264_v2  ;;  %v122_v22 = vsel %vm66_vm4, 1, %v264_v2  ;;  %v123_v23 = vsel %vm67_vm5, 1, %v264_v2  ;;  %176 = vst [vmem:[#allocation2 + $0x70] sm:$0xff] %v119_v19 }
  0x85   :  { %v124_v24 = vsel %vm68_vm6, 1, %v264_v2  ;;  %v125_v25 = vsel %vm69_vm7, 1, %v264_v2  ;;  %177 = vst [vmem:[#allocation2 + $0x78] sm:$0xff] %v120_v20  ;;  %178 = vst [vmem:[#allocation2 + $0x80] sm:$0xff] %v121_v21  ;;  %vm49_vm8 = vcmp.eq.s32.totalorder %v27_v18, %v304_v10  ;;  %vm50_vm9 = vcmp.eq.s32.totalorder %v27_v18, %v307_v11  ;;  %v36_v26 = vpop.permute.xlu1 %35  ;;  %v30_v34 = vpop.permute.xlu0 %29 }
  0x86   :  { %179 = vst [vmem:[#allocation2 + $0x88] sm:$0xff] %v122_v22  ;;  %180 = vst [vmem:[#allocation2 + $0x90] sm:$0xff] %v123_v23  ;;  %vm51_vm10 = vcmp.eq.s32.totalorder %v27_v18, %v310_v12  ;;  %vm52_vm11 = vcmp.eq.s32.totalorder %v27_v18, %v313_v13  ;;  %vm53_vm12 = vcmp.eq.s32.totalorder %v27_v18, %v316_v14  ;;  %v105_v27 = vsel %vm49_vm8, 1, %v264_v2 }
  0x87   :  { %181 = vst [vmem:[#allocation2 + $0x98] sm:$0xff] %v124_v24  ;;  %182 = vst.msk [vmem:[#allocation2 + $0xa0] sm:$0xff] %vm167_vm0, %v125_v25  ;;  %vm54_vm13 = vcmp.eq.s32.totalorder %v27_v18, %v319_v15  ;;  %vm55_vm14 = vcmp.eq.s32.totalorder %v27_v18, %v322_v16  ;;  %v106_v28 = vsel %vm50_vm9, 1, %v264_v2  ;;  %v107_v29 = vsel %vm51_vm10, 1, %v264_v2 }
  0x88   :  { %v108_v30 = vsel %vm52_vm11, 1, %v264_v2  ;;  %v109_v31 = vsel %vm53_vm12, 1, %v264_v2  ;;  %v110_v32 = vsel %vm54_vm13, 1, %v264_v2  ;;  %v111_v33 = vsel %vm55_vm14, 1, %v264_v2  ;;  %161 = vst [vmem:[#allocation2] sm:$0xff] %v105_v27  ;;  %162 = vst [vmem:[#allocation2 + $0x8] sm:$0xff] %v106_v28 }
  0x89   :  { %163 = vst [vmem:[#allocation2 + $0x10] sm:$0xff] %v107_v29  ;;  %164 = vst [vmem:[#allocation2 + $0x18] sm:$0xff] %v108_v30  ;;  %vm70_vm15 = vcmp.eq.s32.totalorder %v36_v26, %v304_v10  ;;  %vm71_vm1 = vcmp.eq.s32.totalorder %v36_v26, %v307_v11  ;;  %vm72_vm2 = vcmp.eq.s32.totalorder %v36_v26, %v310_v12  ;;  %v42_v42 = vpop.permute.xlu1 %41  ;;  %v39_v50 = vpop.permute.xlu0 %38 }
  0x8a   :  { %165 = vst [vmem:[#allocation2 + $0x20] sm:$0xff] %v109_v31  ;;  %166 = vst [vmem:[#allocation2 + $0x28] sm:$0xff] %v110_v32  ;;  %vm73_vm3 = vcmp.eq.s32.totalorder %v36_v26, %v313_v13  ;;  %vm74_vm4 = vcmp.eq.s32.totalorder %v36_v26, %v316_v14  ;;  %vm75_vm5 = vcmp.eq.s32.totalorder %v36_v26, %v319_v15  ;;  %v126_v35 = vsel %vm70_vm15, 1, %v264_v2 }
  0x8b   :  { %168 = vst.msk [vmem:[#allocation2 + $0x30] sm:$0xff] %vm167_vm0, %v111_v33  ;;  %vm76_vm6 = vcmp.eq.s32.totalorder %v36_v26, %v322_v16  ;;  %v127_v36 = vsel %vm71_vm1, 1, %v264_v2  ;;  %v128_v37 = vsel %vm72_vm2, 1, %v264_v2  ;;  %v129_v38 = vsel %vm73_vm3, 1, %v264_v2  ;;  %183 = vst [vmem:[#allocation2 + $0xa8] sm:$0xff] %v126_v35 }
  0x8c   :  { %v130_v39 = vsel %vm74_vm4, 1, %v264_v2  ;;  %v131_v40 = vsel %vm75_vm5, 1, %v264_v2  ;;  %v132_v41 = vsel %vm76_vm6, 1, %v264_v2  ;;  %184 = vst [vmem:[#allocation2 + $0xb0] sm:$0xff] %v127_v36  ;;  %185 = vst [vmem:[#allocation2 + $0xb8] sm:$0xff] %v128_v37  ;;  %vm56_vm7 = vcmp.eq.s32.totalorder %v30_v34, %v304_v10 }
  0x8d   :  { %186 = vst [vmem:[#allocation2 + $0xc0] sm:$0xff] %v129_v38  ;;  %187 = vst [vmem:[#allocation2 + $0xc8] sm:$0xff] %v130_v39  ;;  %vm57_vm8 = vcmp.eq.s32.totalorder %v30_v34, %v307_v11  ;;  %vm58_vm9 = vcmp.eq.s32.totalorder %v30_v34, %v310_v12  ;;  %vm59_vm10 = vcmp.eq.s32.totalorder %v30_v34, %v313_v13  ;;  %v112_v43 = vsel %vm56_vm7, 1, %v264_v2  ;;  %v48_v58 = vpop.permute.xlu1 %47  ;;  %v45_v3 = vpop.permute.xlu0 %44 }
  0x8e   :  { %188 = vst [vmem:[#allocation2 + $0xd0] sm:$0xff] %v131_v40  ;;  %189 = vst.msk [vmem:[#allocation2 + $0xd8] sm:$0xff] %vm167_vm0, %v132_v41  ;;  %vm60_vm11 = vcmp.eq.s32.totalorder %v30_v34, %v316_v14  ;;  %vm61_vm12 = vcmp.eq.s32.totalorder %v30_v34, %v319_v15  ;;  %vm62_vm13 = vcmp.eq.s32.totalorder %v30_v34, %v322_v16  ;;  %v113_v44 = vsel %vm57_vm8, 1, %v264_v2 }
  0x8f   :  { %v114_v45 = vsel %vm58_vm9, 1, %v264_v2  ;;  %v115_v46 = vsel %vm59_vm10, 1, %v264_v2  ;;  %v116_v47 = vsel %vm60_vm11, 1, %v264_v2  ;;  %v117_v48 = vsel %vm61_vm12, 1, %v264_v2  ;;  %169 = vst [vmem:[#allocation2 + $0x38] sm:$0xff] %v112_v43  ;;  %170 = vst [vmem:[#allocation2 + $0x40] sm:$0xff] %v113_v44 }
  0x90   :  { %v118_v49 = vsel %vm62_vm13, 1, %v264_v2  ;;  %171 = vst [vmem:[#allocation2 + $0x48] sm:$0xff] %v114_v45  ;;  %172 = vst [vmem:[#allocation2 + $0x50] sm:$0xff] %v115_v46  ;;  %vm84_vm14 = vcmp.eq.s32.totalorder %v42_v42, %v304_v10  ;;  %vm85_vm15 = vcmp.eq.s32.totalorder %v42_v42, %v307_v11  ;;  %vm86_vm1 = vcmp.eq.s32.totalorder %v42_v42, %v310_v12 }
  0x91   :  { %173 = vst [vmem:[#allocation2 + $0x58] sm:$0xff] %v116_v47  ;;  %174 = vst [vmem:[#allocation2 + $0x60] sm:$0xff] %v117_v48  ;;  %vm87_vm2 = vcmp.eq.s32.totalorder %v42_v42, %v313_v13  ;;  %vm88_vm3 = vcmp.eq.s32.totalorder %v42_v42, %v316_v14  ;;  %vm89_vm4 = vcmp.eq.s32.totalorder %v42_v42, %v319_v15  ;;  %v140_v51 = vsel %vm84_vm14, 1, %v264_v2 }
  0x92   :  { %175 = vst.msk [vmem:[#allocation2 + $0x68] sm:$0xff] %vm167_vm0, %v118_v49  ;;  %vm90_vm5 = vcmp.eq.s32.totalorder %v42_v42, %v322_v16  ;;  %v141_v52 = vsel %vm85_vm15, 1, %v264_v2  ;;  %v142_v53 = vsel %vm86_vm1, 1, %v264_v2  ;;  %v143_v54 = vsel %vm87_vm2, 1, %v264_v2  ;;  %197 = vst [vmem:[#allocation2 + $0x118] sm:$0xff] %v140_v51 }
  0x93   :  { %v144_v55 = vsel %vm88_vm3, 1, %v264_v2  ;;  %v145_v56 = vsel %vm89_vm4, 1, %v264_v2  ;;  %v146_v57 = vsel %vm90_vm5, 1, %v264_v2  ;;  %198 = vst [vmem:[#allocation2 + $0x120] sm:$0xff] %v141_v52  ;;  %199 = vst [vmem:[#allocation2 + $0x128] sm:$0xff] %v142_v53  ;;  %vm77_vm6 = vcmp.eq.s32.totalorder %v39_v50, %v304_v10 }
  0x94   :  { %200 = vst [vmem:[#allocation2 + $0x130] sm:$0xff] %v143_v54  ;;  %201 = vst [vmem:[#allocation2 + $0x138] sm:$0xff] %v144_v55  ;;  %vm78_vm7 = vcmp.eq.s32.totalorder %v39_v50, %v307_v11  ;;  %vm79_vm8 = vcmp.eq.s32.totalorder %v39_v50, %v310_v12  ;;  %vm80_vm9 = vcmp.eq.s32.totalorder %v39_v50, %v313_v13  ;;  %v133_v59 = vsel %vm77_vm6, 1, %v264_v2 }
  0x95   :  { %202 = vst [vmem:[#allocation2 + $0x140] sm:$0xff] %v145_v56  ;;  %203 = vst.msk [vmem:[#allocation2 + $0x148] sm:$0xff] %vm167_vm0, %v146_v57  ;;  %vm81_vm10 = vcmp.eq.s32.totalorder %v39_v50, %v316_v14  ;;  %vm82_vm11 = vcmp.eq.s32.totalorder %v39_v50, %v319_v15  ;;  %vm83_vm12 = vcmp.eq.s32.totalorder %v39_v50, %v322_v16  ;;  %v134_v60 = vsel %vm78_vm7, 1, %v264_v2 }
  0x96   :  { %v135_v61 = vsel %vm79_vm8, 1, %v264_v2  ;;  %v136_v62 = vsel %vm80_vm9, 1, %v264_v2  ;;  %v137_v63 = vsel %vm81_vm10, 1, %v264_v2  ;;  %v138_v0 = vsel %vm82_vm11, 1, %v264_v2  ;;  %190 = vst [vmem:[#allocation2 + $0xe0] sm:$0xff] %v133_v59  ;;  %191 = vst [vmem:[#allocation2 + $0xe8] sm:$0xff] %v134_v60 }
  0x97   :  { %v139_v1 = vsel %vm83_vm12, 1, %v264_v2  ;;  %192 = vst [vmem:[#allocation2 + $0xf0] sm:$0xff] %v135_v61  ;;  %193 = vst [vmem:[#allocation2 + $0xf8] sm:$0xff] %v136_v62  ;;  %vm98_vm13 = vcmp.eq.s32.totalorder %v48_v58, %v304_v10  ;;  %vm99_vm14 = vcmp.eq.s32.totalorder %v48_v58, %v307_v11  ;;  %vm100_vm15 = vcmp.eq.s32.totalorder %v48_v58, %v310_v12 }
  0x98   :  { %194 = vst [vmem:[#allocation2 + $0x100] sm:$0xff] %v137_v63  ;;  %195 = vst [vmem:[#allocation2 + $0x108] sm:$0xff] %v138_v0  ;;  %vm101_vm1 = vcmp.eq.s32.totalorder %v48_v58, %v313_v13  ;;  %vm102_vm2 = vcmp.eq.s32.totalorder %v48_v58, %v316_v14  ;;  %vm103_vm3 = vcmp.eq.s32.totalorder %v48_v58, %v319_v15  ;;  %v154_v4 = vsel %vm98_vm13, 1, %v264_v2 }
  0x99   :  { %196 = vst.msk [vmem:[#allocation2 + $0x110] sm:$0xff] %vm167_vm0, %v139_v1  ;;  %vm104_vm4 = vcmp.eq.s32.totalorder %v48_v58, %v322_v16  ;;  %v155_v5 = vsel %vm99_vm14, 1, %v264_v2  ;;  %v156_v6 = vsel %vm100_vm15, 1, %v264_v2  ;;  %v157_v7 = vsel %vm101_vm1, 1, %v264_v2  ;;  %211 = vst [vmem:[#allocation2 + $0x188] sm:$0xff] %v154_v4 }
  0x9a   :  { %v158_v8 = vsel %vm102_vm2, 1, %v264_v2  ;;  %v159_v9 = vsel %vm103_vm3, 1, %v264_v2  ;;  %v160_v17 = vsel %vm104_vm4, 1, %v264_v2  ;;  %212 = vst [vmem:[#allocation2 + $0x190] sm:$0xff] %v155_v5  ;;  %213 = vst [vmem:[#allocation2 + $0x198] sm:$0xff] %v156_v6  ;;  %vm91_vm5 = vcmp.eq.s32.totalorder %v45_v3, %v304_v10 }
  0x9b   :  { %214 = vst [vmem:[#allocation2 + $0x1a0] sm:$0xff] %v157_v7  ;;  %215 = vst [vmem:[#allocation2 + $0x1a8] sm:$0xff] %v158_v8  ;;  %vm92_vm6 = vcmp.eq.s32.totalorder %v45_v3, %v307_v11  ;;  %vm93_vm7 = vcmp.eq.s32.totalorder %v45_v3, %v310_v12  ;;  %vm94_vm8 = vcmp.eq.s32.totalorder %v45_v3, %v313_v13  ;;  %v147_v10 = vsel %vm91_vm5, 1, %v264_v2 }
  0x9c   :  { %216 = vst [vmem:[#allocation2 + $0x1b0] sm:$0xff] %v159_v9  ;;  %217 = vst.msk [vmem:[#allocation2 + $0x1b8] sm:$0xff] %vm167_vm0, %v160_v17  ;;  %vm95_vm9 = vcmp.eq.s32.totalorder %v45_v3, %v316_v14  ;;  %vm96_vm10 = vcmp.eq.s32.totalorder %v45_v3, %v319_v15  ;;  %vm97_vm11 = vcmp.eq.s32.totalorder %v45_v3, %v322_v16  ;;  %v148_v11 = vsel %vm92_vm6, 1, %v264_v2 }
  0x9d   :  { %v149_v18 = vsel %vm93_vm7, 1, %v264_v2  ;;  %v150_v12 = vsel %vm94_vm8, 1, %v264_v2  ;;  %v151_v13 = vsel %vm95_vm9, 1, %v264_v2  ;;  %v152_v14 = vsel %vm96_vm10, 1, %v264_v2  ;;  %204 = vst [vmem:[#allocation2 + $0x150] sm:$0xff] %v147_v10  ;;  %205 = vst [vmem:[#allocation2 + $0x158] sm:$0xff] %v148_v11 }
  0x9e   :  { %v153_v15 = vsel %vm97_vm11, 1, %v264_v2  ;;  %206 = vst [vmem:[#allocation2 + $0x160] sm:$0xff] %v149_v18  ;;  %207 = vst [vmem:[#allocation2 + $0x168] sm:$0xff] %v150_v12 }
  0x9f   :  { %208 = vst [vmem:[#allocation2 + $0x170] sm:$0xff] %v151_v13  ;;  %209 = vst [vmem:[#allocation2 + $0x178] sm:$0xff] %v152_v14 }
  0xa0   :  { %210 = vst.msk [vmem:[#allocation2 + $0x180] sm:$0xff] %vm167_vm0, %v153_v15 }
  0xa1   :  { %251 = shalt.err (!%p248_p4)
}
  0xa2   :  { %s252_s26 = scalar_lea.hbm %s464_s1, 7168 }
  0xa3   :  { %p253_p5 = scmp.ne.s32.totalorder %s464_s1, %s252_s26  ;;  %p256_p6 = scmp.lt.u32.totalorder %s252_s26, %s464_s1 }
  0xa5   :  { %p258_p7 = pnand %p256_p6, %p253_p5 }
  0xa7   :  { %261 = shalt.err (!%p258_p7)
}
  0xa8   :  { %s266_s2 = smov 896   ;;  %s267_s3 = smov 56  }
  0xa9   :  { %229 = dma.vmem_to_hbm [thread:$0]  %s435_s22, 7168, %s464_s1, [#allocation3], %s266_s2, %s266_s2, %s267_s3  }
  0xaa   :  { %262 = dma.done.wait [#allocation3], 7168  }
  0xab   :  { %263 = vsyncadd [#allocation3], 4294960128 }
  0xac   :  { %233 = vsyncpa [#allocation3], 1 }

</bundles_post_ra>
